<compile_context>
chip_gen: v7x
topology: tpu7x:2x2x1
jax: 0.10.0
libtpu: 0.0.40
codegen_flags: <defaults>
</compile_context>

<pallas_src>
import functools

import jax
import jax.numpy as jnp
from jax import lax
from jax.experimental import pallas as pl
from jax.experimental.pallas import tpu as pltpu

_EPS = 1e-12  # torch.nn.functional.normalize default eps


def _round_up(x, m):
    return (x + m - 1) // m * m


# --------------------------------------------------------------------------
# Kernel 1: per-row inverse L2 norm  (1 / max(||row||, eps))
# --------------------------------------------------------------------------
def _row_inv_norm_kernel(x_ref, o_ref):
    x = x_ref[...].astype(jnp.float32)
    ss = jnp.sum(x * x, axis=-1, keepdims=True)
    # rsqrt(max(ss, eps^2)) == 1 / max(sqrt(ss), eps); rsqrt runs on the EUP.
    o_ref[...] = lax.rsqrt(jnp.maximum(ss, jnp.float32(_EPS * _EPS)))


def _row_inv_norms(x, tile_r):
    r, e = x.shape
    return pl.pallas_call(
        _row_inv_norm_kernel,
        out_shape=jax.ShapeDtypeStruct((r, 1), jnp.float32),
        grid_spec=pltpu.PrefetchScalarGridSpec(
            num_scalar_prefetch=0,
            grid=(r // tile_r,),
            in_specs=[pl.BlockSpec((tile_r, e), lambda i: (i, 0))],
            out_specs=pl.BlockSpec((tile_r, 1), lambda i: (i, 0)),
        ),
        compiler_params=pltpu.CompilerParams(
            dimension_semantics=("parallel",)),
    )(x)


# --------------------------------------------------------------------------
# Kernel 2: tiled normalized matmul + CosFace margin/scale epilogue
# --------------------------------------------------------------------------
def _cosface_kernel(emb_ref, inv_e_ref, w_ref, inv_w_ref, lab_ref, out_ref,
                    *, scale, margin, tile_c, training):
    compute_dtype = emb_ref.dtype  # bf16 inputs stay bf16 for the MXU

    # Normalize via precomputed inverse row norms (no per-tile reduce / rsqrt).
    xn = (emb_ref[...].astype(jnp.float32) * inv_e_ref[...]).astype(compute_dtype)
    wn = (w_ref[...].astype(jnp.float32) * inv_w_ref[...]).astype(compute_dtype)

    # [TB, E] x [TC, E] contracted on E -> [TB, TC]; feeds MXU directly,
    # no in-VMEM transpose of the weight tile.
    logits = lax.dot_general(
        xn, wn,
        dimension_numbers=(((1,), (1,)), ((), ())),
        preferred_element_type=jnp.float32)

    if training:
        labels = lab_ref[...]                                   # [TB, 1] int32
        tb, tc = logits.shape
        class_ids = (pl.program_id(1) * tile_c
                     + lax.broadcasted_iota(jnp.int32, (tb, tc), 1))
        is_label = class_ids == labels                          # [TB, TC]
        # (logits - margin*onehot) * scale  ==  logits*scale - (scale*margin)*onehot
        logits = logits * jnp.float32(scale) - jnp.where(
            is_label, jnp.float32(scale * margin), jnp.float32(0.0))

    out_ref[...] = logits.astype(out_ref.dtype)


# --------------------------------------------------------------------------
# Wrapper: padding, tiling, pallas_call plumbing
# --------------------------------------------------------------------------
def cosface_margin_loss(embeddings, weights, labels, *, scale=32.0, margin=0.1,
                        training=True):
    """CosFaceMarginLoss.forward.

    embeddings: [B, E] float32/bf16
    weights:    [C, E] float32/bf16  (the nn.Parameter)
    labels:     [B]    integer
    returns:    [B, C] float32 logits (margined + scaled if training)
    """
    B, E = embeddings.shape
    C, E2 = weights.shape
    assert E == E2, "embedding_size mismatch"

    # ---- TPU-friendly padded shapes / tile sizes -------------------------
    e_pad = _round_up(E, 128)                       # contraction dim, lane-aligned
    tile_b = 256 if B >= 256 else _round_up(B, 8)   # <=256 rows per batch tile
    b_pad = _round_up(B, tile_b)
    c128 = _round_up(C, 128)
    tile_c = 512 if c128 >= 512 else c128           # lane-dense output tile
    c_pad = _round_up(C, tile_c)

    emb_p = jnp.pad(embeddings, ((0, b_pad - B), (0, e_pad - E)))
    w_p = jnp.pad(weights, ((0, c_pad - C), (0, e_pad - E)))
    lab_p = jnp.pad(labels.astype(jnp.int32), (0, b_pad - B),
                    constant_values=-1).reshape(b_pad, 1)

    # Inverse row norms, computed exactly once per matrix.
    inv_e = _row_inv_norms(emb_p, tile_b)           # [b_pad, 1] f32
    inv_w = _row_inv_norms(w_p, tile_c)             # [c_pad, 1] f32

    grid = (b_pad // tile_b, c_pad // tile_c)
    kernel = functools.partial(_cosface_kernel, scale=float(scale),
                               margin=float(margin), tile_c=tile_c,
                               training=training)

    itemsize = jnp.dtype(embeddings.dtype).itemsize
    out = pl.pallas_call(
        kernel,
        out_shape=jax.ShapeDtypeStruct((b_pad, c_pad), jnp.float32),
        grid_spec=pltpu.PrefetchScalarGridSpec(
            num_scalar_prefetch=0,
            grid=grid,
            in_specs=[
                pl.BlockSpec((tile_b, e_pad), lambda i, j: (i, 0)),  # embeddings
                pl.BlockSpec((tile_b, 1),     lambda i, j: (i, 0)),  # inv emb norm
                pl.BlockSpec((tile_c, e_pad), lambda i, j: (j, 0)),  # weights
                pl.BlockSpec((tile_c, 1),     lambda i, j: (j, 0)),  # inv w norm
                pl.BlockSpec((tile_b, 1),     lambda i, j: (i, 0)),  # labels
            ],
            out_specs=pl.BlockSpec((tile_b, tile_c), lambda i, j: (i, j)),
        ),
        compiler_params=pltpu.CompilerParams(
            dimension_semantics=("parallel", "parallel")),
        cost_estimate=pl.CostEstimate(
            flops=2 * b_pad * c_pad * e_pad,
            transcendentals=0,
            bytes_accessed=(b_pad * e_pad + grid[0] * c_pad * e_pad) * itemsize
                           + b_pad * c_pad * 4),
    )(emb_p, inv_e, w_p, inv_w, lab_p)

    return out[:B, :C]


# --------------------------------------------------------------------------
# Pure-JAX reference (mirrors the PyTorch module)
# --------------------------------------------------------------------------
def _reference(embeddings, weights, labels, *, scale=32.0, margin=0.1,
               training=True):
    eps = _EPS
    xn = embeddings / jnp.maximum(
        jnp.linalg.norm(embeddings, axis=-1, keepdims=True), eps)
    wn = weights / jnp.maximum(
        jnp.linalg.norm(weights, axis=-1, keepdims=True), eps)
    logits = xn @ wn.T
    if training:
        onehot = jax.nn.one_hot(labels, weights.shape[0], dtype=logits.dtype)
        logits = (logits - margin * onehot) * scale
    return logits


if __name__ == "__main__":
    key = jax.random.PRNGKey(0)
    B, E, C = 8, 64, 40          # batch, embedding_size, number_of_classes
    scale, margin = 32.0, 0.1

    k_emb, k_w, k_lab = jax.random.split(key, 3)
    embeddings = jax.random.normal(k_emb, (B, E), dtype=jnp.float32)

    # nn.init.xavier_uniform_ on a [C, E] weight: bound = sqrt(6/(E+C))
    bound = (6.0 / (E + C)) ** 0.5
    weights = jax.random.uniform(k_w, (C, E), dtype=jnp.float32,
                                 minval=-bound, maxval=bound)
    labels = jax.random.randint(k_lab, (B,), 0, C, dtype=jnp.int32)

    out = cosface_margin_loss(embeddings, weights, labels,
                              scale=scale, margin=margin, training=True)
    out = jax.block_until_ready(out)

    ref = _reference(embeddings, weights, labels,
                     scale=scale, margin=margin, training=True)
    assert out.shape == (B, C)
    assert jnp.allclose(out, ref, atol=1e-4, rtol=1e-4), "mismatch vs reference"

    # Also exercise the eval path (no margin / scale).
    out_eval = cosface_margin_loss(embeddings, weights, labels,
                                   scale=scale, margin=margin, training=False)
    ref_eval = _reference(embeddings, weights, labels,
                          scale=scale, margin=margin, training=False)
    assert jnp.allclose(jax.block_until_ready(out_eval), ref_eval,
                        atol=1e-4, rtol=1e-4), "mismatch vs reference (eval)"

    print("KERNEL_OK")
</pallas_src>

<mosaic_0001>
module attributes {stable_mosaic.version = 11 : i64} {
  func.func @_row_inv_norm_kernel(%arg0: i32, %arg1: memref<8x128xf32, #tpu.memory_space<vmem>>, %arg2: memref<8x1xf32, #tpu.memory_space<vmem>>) attributes {dimension_semantics = [#tpu.dimension_semantics<parallel>], iteration_bounds = array<i64: 1>, scalar_prefetch = 0 : i64, scratch_operands = 0 : i64, tpu.core_type = #tpu.core_type<tc>, window_params = [{transform_indices = @transform_0, window_bounds = array<i64: 8, 128>}, {transform_indices = @transform_1, window_bounds = array<i64: 8, 1>}]} {
    %c0 = arith.constant 0 : index
    %c0_0 = arith.constant 0 : index
    %0 = vector.load %arg1[%c0, %c0_0] : memref<8x128xf32, #tpu.memory_space<vmem>>, vector<8x128xf32>
    %1 = arith.mulf %0, %0 : vector<8x128xf32>
    %cst = arith.constant dense<0.000000e+00> : vector<8xf32>
    %2 = vector.multi_reduction <add>, %1, %cst [1] : vector<8x128xf32> to vector<8xf32>
    %3 = vector.shape_cast %2 : vector<8xf32> to vector<8x1xf32>
    %cst_1 = arith.constant 1.000000e-24 : f32
    %4 = vector.broadcast %cst_1 : f32 to vector<8x1xf32>
    %5 = arith.maximumf %3, %4 : vector<8x1xf32>
    %6 = math.rsqrt %5 : vector<8x1xf32>
    %c0_2 = arith.constant 0 : index
    %c0_3 = arith.constant 0 : index
    %7 = vector.load %arg2[%c0_2, %c0_3] : memref<8x1xf32, #tpu.memory_space<vmem>>, vector<8x1xf32>
    tpu.vector_store %arg2[%c0_2, %c0_3], %6 {strides = array<i32>} : memref<8x1xf32, #tpu.memory_space<vmem>>, vector<8x1xf32>,
    return
  }
  func.func @transform_0(%arg0: i32) -> (i32, i32) {
    %c0_i32 = arith.constant 0 : i32
    %c0_i32_0 = arith.constant 0 : i32
    return %arg0, %c0_i32 : i32, i32
  }
  func.func @transform_1(%arg0: i32) -> (i32, i32) {
    %c0_i32 = arith.constant 0 : i32
    %c0_i32_0 = arith.constant 0 : i32
    return %arg0, %c0_i32 : i32, i32
  }
}

</mosaic_0001>

<bundles_post_ra>
// kernel: tpu_custom_call.1
= control target key start
LH: loop header
LB: loop body
LE: loop exit
PB: predicated region body
PF: predicated region fallthrough
CT: control target
= control target key end

     0   :  { %6 = vsyncpa [#allocation3], 0  ;;  %s60_s6 = smov [#allocation2]   ;;  %s86_s0 = inlined_call_operand.hbm [shape: f32[8,128], index: 0, kind: input, shape index: {}]   ;;  %s87_s1 = inlined_call_operand.vmem [shape: f32[8,1], index: 1, kind: output, shape index: {}]  }
   0x1   :  { %s13_s7 = sshll.u32 %s60_s6, 4  ;;  %s36_s10 = scalar_lea.hbm %s86_s0, 128  ;;  %s14_s7 = int_to_ptr.vmem [resolvable:$true] %s13_s7 }
   0x2   :  { %p37_p0 = scmp.ne.s32.totalorder %s86_s0, %s36_s10  ;;  %p40_p1 = scmp.lt.u32.totalorder %s36_s10, %s86_s0 }
   0x4   :  { %p42_p2 = pnand %p40_p1, %p37_p0 }
   0x6   :  { %45 = shalt.err (!%p42_p2)
}
   0x7   :  { %s46_s15 = scalar_lea.vmem %s14_s7, 128  ;;  %p51_p4 = scmp.lt.s32.totalorder %s14_s7, %s14_s7 }
   0x8   :  { %p47_p3 = scmp.ne.s32.totalorder %s14_s7, %s46_s15  ;;  %p52_p5 = scmp.lt.s32.totalorder %s46_s15, %s46_s15 }
   0xa   :  { %p53_p6 = por %p52_p5, %p51_p4 }
   0xc   :  { %p54_p7 = pnand %p53_p6, %p47_p3 }
   0xe   :  { %57 = shalt.err (!%p54_p7)
}
   0xf   :  { %16 = dma.hbm_to_vmem [thread:$0]  %s86_s0, 128, %s14_s7, [#allocation3]  }
  0x10   :  { %58 = dma.done.wait [#allocation3], 128  }
  0x11   :  { %59 = vsyncadd [#allocation3], 4294967168  ;;  %v20_v0 = vld [vmem:[#allocation2] sm:$0xff]  ;;  %vm26_vm0 = vcmask 7168  }
  0x12   :  { %v21_v1 = vmul.f32 %v20_v0, %v20_v0 }
  0x14   :  { %22 = vadd.xlane.f32.xlu0 %v21_v1 }
  0xa1   :  { %v23_v2 = vpop.xlane.xlu0 %22 }
  0xa2   :  { %v24_v3 = vmax.f32 %v23_v2, 1e-24 }
  0xa4   :  { %34 = vrsqrt.f32 %v24_v3 }
  0xae   :  { %v35_v4 = vpop.eup %34 }
  0xaf   :  { %27 = vst.msk [vmem:[%s87_s1] sm:$0xff] %vm26_vm0, %v35_v4 }
  0xb0   :  { %32 = vsyncpa [#allocation3], 1 }

</bundles_post_ra>
